<compile_context>
chip_gen: v6e
topology: v6e:2x2x1
jax: 0.10.0
libtpu: 0.0.40
codegen_flags: <defaults>
</compile_context>

<pallas_src>
import jax
import jax.numpy as jnp
from jax import lax
from jax.experimental import pallas as pl
from jax.experimental.pallas import tpu as pltpu

EPS = 1e-5


def _banded_conv_weight(w_oihw, width):
    """(Cout, Cin, 3, 3) conv weight -> (3, width*Cin, width*Cout) per-dy banded blocks.

    Block dy, row index u*Cin + ci (u = unpadded input column), col index
    w*Cout + co.  Entries that would multiply the (zero) horizontal padding are
    omitted, so the GEMM operates directly on unpadded rows.
    """
    co_, ci_, kh, kw = w_oihw.shape
    w_hwio = jnp.transpose(w_oihw, (2, 3, 1, 0)).astype(jnp.float32)  # (3,3,Ci,Co)
    segs = []
    for dy in range(kh):
        seg = jnp.zeros((width * ci_, width * co_), jnp.float32)
        for dx in range(kw):
            # shift[u, w] = 1  iff  u == w + dx - 1  (input col read by output col w)
            shift = jnp.eye(width, width, k=1 - dx, dtype=jnp.float32)
            seg = seg + jnp.einsum('uw,io->uiwo', shift, w_hwio[dy, dx]
                                   ).reshape(width * ci_, width * co_)
        segs.append(seg)
    return jnp.stack(segs, axis=0)                    # (3, W*Cin, W*Cout)


def double_conv2d(x_nchw, w1_oihw, b1, w2_oihw, b2, gamma, beta):
    """Forward pass of DoubleConv2D (training-mode BN, shared gamma/beta)."""
    # Per-channel conv biases are cancelled exactly by BN's mean subtraction.
    del b1, b2
    N, Cin, H, W = x_nchw.shape
    Cout = w1_oihw.shape[0]
    WCin, WCout = W * Cin, W * Cout
    NH = N * H
    # Lane-dense / (8,128)-friendly assumptions of this kernel.
    assert WCout % 128 == 0 and NH % 8 == 0, "generalize tiling before reuse"

    # ---- wrapper-side layout only (no compute) ------------------------------
    x_nhwc = jnp.transpose(x_nchw, (0, 2, 3, 1)).astype(jnp.float32)
    x_rows = jnp.pad(x_nhwc.reshape(N, H, WCin), ((0, 0), (1, 1), (0, 0)))
    # row-im2col for conv1: row (n,h) = [input row h-1 | h | h+1] (zeros at edges)
    # TODO(synk): at large N/H/W, build this in-kernel with the same roll-and-mask
    #             trick to avoid 3x activation duplication in HBM.
    m1 = jnp.concatenate([x_rows[:, 0:H], x_rows[:, 1:H + 1], x_rows[:, 2:H + 2]],
                         axis=-1).reshape(NH, 3 * WCin).astype(jnp.bfloat16)

    B1 = _banded_conv_weight(w1_oihw, W).reshape(3 * WCin, WCout).astype(jnp.bfloat16)
    B2 = _banded_conv_weight(w2_oihw, W).astype(jnp.bfloat16)        # (3, WCout, WCout)

    gamma_t = jnp.tile(gamma.astype(jnp.float32), W).reshape(1, WCout)
    beta_t = jnp.tile(beta.astype(jnp.float32), W).reshape(1, WCout)

    inv_n = 1.0 / float(N * H * W)   # samples per channel for batch statistics

    def kernel(m1_ref, b1m_ref, b2_hbm_ref, gamma_ref, beta_ref, out_ref,
               b2_vmem, b2_sem):
        # Start B2 HBM->VMEM DMA; hide it behind conv1 + BN + SiLU.
        b2_cp = pltpu.make_async_copy(b2_hbm_ref, b2_vmem, b2_sem)
        b2_cp.start()

        # Channel-group indicator built in-kernel (VPU, hides under MXU slack):
        # G[i, j] = 1 iff lanes i and j hold the same channel.
        ch_i = lax.broadcasted_iota(jnp.int32, (WCout, WCout), 0) % Cout
        ch_j = lax.broadcasted_iota(jnp.int32, (WCout, WCout), 1) % Cout
        g = (ch_i == ch_j).astype(jnp.float32)

        def bn_silu(h):
            # One-pass batch stats; per-channel reduce + broadcast back to the
            # packed lane layout via one tiny (2,128)x(128,128) MXU matmul.
            s1 = jnp.sum(h, axis=0, keepdims=True)          # (1, W*Cout)
            s2 = jnp.sum(h * h, axis=0, keepdims=True)
            sums = jnp.dot(jnp.concatenate([s1, s2], axis=0), g,
                           preferred_element_type=jnp.float32)        # (2, W*Cout)
            mean = sums[0:1, :] * inv_n
            var = sums[1:2, :] * inv_n - mean * mean        # biased batch variance
            y = (h - mean) * lax.rsqrt(var + EPS) * gamma_ref[...] + beta_ref[...]
            return y * jax.nn.sigmoid(y)                    # SiLU

        # ---- conv1: single banded GEMM (K = 3*W*Cin, bf16 operands) ----------
        a1 = bn_silu(jnp.dot(m1_ref[...], b1m_ref[...],
                             preferred_element_type=jnp.float32))     # (N*H, W*Cout) f32

        # ---- conv2: roll-and-mask, three accumulated (NH,128)x(128,128) GEMMs ----
        h_idx = lax.broadcasted_iota(jnp.int32, (NH, WCout), 0) % H
        # row h-1 (dy=0): zero where h == 0 (per-batch top halo / batch wrap)
        a1_prev = jnp.where(h_idx == 0, 0.0, pltpu.roll(a1, 1, axis=0))
        # row h+1 (dy=2): zero where h == H-1 (per-batch bottom halo / batch wrap)
        a1_next = jnp.where(h_idx == H - 1, 0.0, pltpu.roll(a1, NH - 1, axis=0))

        b2_cp.wait()   # B2 now resident in VMEM
        acc = jnp.dot(a1_prev.astype(jnp.bfloat16), b2_vmem[0],
                      preferred_element_type=jnp.float32)
        acc = acc + jnp.dot(a1.astype(jnp.bfloat16), b2_vmem[1],
                            preferred_element_type=jnp.float32)
        acc = acc + jnp.dot(a1_next.astype(jnp.bfloat16), b2_vmem[2],
                            preferred_element_type=jnp.float32)

        out_ref[...] = bn_silu(acc)

    out_flat = pl.pallas_call(
        kernel,
        out_shape=jax.ShapeDtypeStruct((NH, WCout), jnp.float32),  # lane-dense output
        in_specs=[
            pl.BlockSpec(memory_space=pltpu.MemorySpace.VMEM),     # m1
            pl.BlockSpec(memory_space=pltpu.MemorySpace.VMEM),     # B1
            pl.BlockSpec(memory_space=pl.ANY),                     # B2 (manual DMA)
            pl.BlockSpec(memory_space=pltpu.MemorySpace.VMEM),     # gamma
            pl.BlockSpec(memory_space=pltpu.MemorySpace.VMEM),     # beta
        ],
        out_specs=pl.BlockSpec(memory_space=pltpu.MemorySpace.VMEM),
        scratch_shapes=[
            pltpu.VMEM((3, WCout, WCout), jnp.bfloat16),           # B2 landing buffer
            pltpu.SemaphoreType.DMA(()),                           # its DMA semaphore
        ],
    )(m1, B1, B2, gamma_t, beta_t)

    return jnp.transpose(out_flat.reshape(N, H, W, Cout), (0, 3, 1, 2))


def reference(x, w1, b1, w2, b2, gamma, beta):
    # pure-JAX f32 reference matching PyTorch forward semantics (NCHW, with biases)
    def conv(x, w, b):
        y = lax.conv_general_dilated(
            x, w, window_strides=(1, 1), padding=((1, 1), (1, 1)),
            dimension_numbers=('NCHW', 'OIHW', 'NCHW'))
        return y + b[None, :, None, None]

    def bn_silu(y):
        mean = jnp.mean(y, axis=(0, 2, 3), keepdims=True)
        var = jnp.mean((y - mean) ** 2, axis=(0, 2, 3), keepdims=True)
        z = ((y - mean) * lax.rsqrt(var + EPS)
             * gamma[None, :, None, None] + beta[None, :, None, None])
        return z * jax.nn.sigmoid(z)

    y = bn_silu(conv(x, w1, b1))
    return bn_silu(conv(y, w2, b2))


if __name__ == "__main__":
    N, Cin, Cout, H, W = 2, 4, 8, 16, 16   # W * Cout = 128 -> lane-dense packing

    key = jax.random.PRNGKey(0)
    kx, k1, kb1, k2, kb2, kg, kb = jax.random.split(key, 7)

    x = jax.random.normal(kx, (N, Cin, H, W), dtype=jnp.float32)
    w1 = 0.1 * jax.random.normal(k1, (Cout, Cin, 3, 3), dtype=jnp.float32)
    b1 = 0.1 * jax.random.normal(kb1, (Cout,), dtype=jnp.float32)
    w2 = 0.1 * jax.random.normal(k2, (Cout, Cout, 3, 3), dtype=jnp.float32)
    b2 = 0.1 * jax.random.normal(kb2, (Cout,), dtype=jnp.float32)
    # shared BatchNorm parameters (same instance used twice in the Sequential)
    gamma = 1.0 + 0.1 * jax.random.normal(kg, (Cout,), dtype=jnp.float32)
    beta = 0.1 * jax.random.normal(kb, (Cout,), dtype=jnp.float32)

    out = double_conv2d(x, w1, b1, w2, b2, gamma, beta)
    out = jax.block_until_ready(out)

    ref = reference(x, w1, b1, w2, b2, gamma, beta)
    assert out.shape == (N, Cout, H, W)
    # bf16 MXU operands (f32 accumulation / BN / SiLU) -> tolerance reflects bf16
    # input quantization; the f32 reference is exact.
    assert jnp.allclose(out, ref, atol=5e-2, rtol=5e-2), \
        f"max err {jnp.max(jnp.abs(out - ref))}"

    print("KERNEL_OK")
</pallas_src>

<mosaic_0001>
module attributes {stable_mosaic.version = 11 : i64} {
  func.func @kernel(%arg0: memref<32x192xbf16, #tpu.memory_space<vmem>>, %arg1: memref<192x128xbf16, #tpu.memory_space<vmem>>, %arg2: memref<3x128x128xbf16, #tpu.memory_space<any>>, %arg3: memref<1x128xf32, #tpu.memory_space<vmem>>, %arg4: memref<1x128xf32, #tpu.memory_space<vmem>>, %arg5: memref<32x128xf32, #tpu.memory_space<vmem>>, %arg6: memref<3x128x128xbf16, #tpu.memory_space<vmem>>, %arg7: memref<!tpu.dma_semaphore, #tpu.memory_space<semaphore_mem>>) attributes {dimension_semantics = [], scalar_prefetch = 0 : i64, scratch_operands = 2 : i64, tpu.core_type = #tpu.core_type<tc>} {
    tpu.enqueue_dma source(%arg2 : memref<3x128x128xbf16, #tpu.memory_space<any>>) target(%arg6 : memref<3x128x128xbf16, #tpu.memory_space<vmem>>) target_semaphore(%arg7 : memref<!tpu.dma_semaphore, #tpu.memory_space<semaphore_mem>>)
    %0 = tpu.iota {dimensions = array<i32: 0>} : vector<128x128xi32>
    %c8_i32 = arith.constant 8 : i32
    %c0_i32 = arith.constant 0 : i32
    %1 = arith.cmpi eq, %c8_i32, %c0_i32 : i32
    %c1_i32 = arith.constant 1 : i32
    %2 = arith.select %1, %c1_i32, %c8_i32 : i32
    %3 = vector.broadcast %2 : i32 to vector<128x128xi32>
    %4 = arith.remsi %0, %3 : vector<128x128xi32>
    %c0_i32_0 = arith.constant 0 : i32
    %5 = vector.broadcast %c0_i32_0 : i32 to vector<128x128xi32>
    %6 = arith.cmpi ne, %4, %5 : vector<128x128xi32>
    %c0_i32_1 = arith.constant 0 : i32
    %7 = vector.broadcast %c0_i32_1 : i32 to vector<128x128xi32>
    %8 = arith.cmpi slt, %4, %7 : vector<128x128xi32>
    %c0_i32_2 = arith.constant 0 : i32
    %9 = arith.cmpi slt, %2, %c0_i32_2 : i32
    %10 = vector.broadcast %9 : i1 to vector<128x128xi1>
    %11 = vector.broadcast %10 : vector<128x128xi1> to vector<128x128xi1>
    %12 = arith.xori %8, %11 : vector<128x128xi1>
    %13 = arith.andi %12, %6 : vector<128x128xi1>
    %14 = vector.broadcast %2 : i32 to vector<128x128xi32>
    %15 = arith.addi %4, %14 : vector<128x128xi32>
    %16 = arith.select %13, %15, %4 : vector<128x128xi1>, vector<128x128xi32>
    %17 = tpu.iota {dimensions = array<i32: 1>} : vector<128x128xi32>
    %c8_i32_3 = arith.constant 8 : i32
    %c0_i32_4 = arith.constant 0 : i32
    %18 = arith.cmpi eq, %c8_i32_3, %c0_i32_4 : i32
    %c1_i32_5 = arith.constant 1 : i32
    %19 = arith.select %18, %c1_i32_5, %c8_i32_3 : i32
    %20 = vector.broadcast %19 : i32 to vector<128x128xi32>
    %21 = arith.remsi %17, %20 : vector<128x128xi32>
    %c0_i32_6 = arith.constant 0 : i32
    %22 = vector.broadcast %c0_i32_6 : i32 to vector<128x128xi32>
    %23 = arith.cmpi ne, %21, %22 : vector<128x128xi32>
    %c0_i32_7 = arith.constant 0 : i32
    %24 = vector.broadcast %c0_i32_7 : i32 to vector<128x128xi32>
    %25 = arith.cmpi slt, %21, %24 : vector<128x128xi32>
    %c0_i32_8 = arith.constant 0 : i32
    %26 = arith.cmpi slt, %19, %c0_i32_8 : i32
    %27 = vector.broadcast %26 : i1 to vector<128x128xi1>
    %28 = vector.broadcast %27 : vector<128x128xi1> to vector<128x128xi1>
    %29 = arith.xori %25, %28 : vector<128x128xi1>
    %30 = arith.andi %29, %23 : vector<128x128xi1>
    %31 = vector.broadcast %19 : i32 to vector<128x128xi32>
    %32 = arith.addi %21, %31 : vector<128x128xi32>
    %33 = arith.select %30, %32, %21 : vector<128x128xi1>, vector<128x128xi32>
    %34 = arith.cmpi eq, %16, %33 : vector<128x128xi32>
    %35 = arith.extui %34 : vector<128x128xi1> to vector<128x128xi32>
    %36 = arith.sitofp %35 : vector<128x128xi32> to vector<128x128xf32>
    %c0 = arith.constant 0 : index
    %c0_9 = arith.constant 0 : index
    %37 = vector.load %arg0[%c0, %c0_9] : memref<32x192xbf16, #tpu.memory_space<vmem>>, vector<32x192xbf16>
    %c0_10 = arith.constant 0 : index
    %c0_11 = arith.constant 0 : index
    %38 = vector.load %arg1[%c0_10, %c0_11] : memref<192x128xbf16, #tpu.memory_space<vmem>>, vector<192x128xbf16>
    %cst = arith.constant dense<0.000000e+00> : vector<32x128xf32>
    %39 = tpu.matmul %37, %38, %cst {dimension_numbers = #tpu.dot_dimension_numbers<[1], [0], [0], [1], [0, 0, 1, 1], [], []>} : vector<32x192xbf16>, vector<192x128xbf16>, vector<32x128xf32> -> vector<32x128xf32>
    %cst_12 = arith.constant dense<0.000000e+00> : vector<128xf32>
    %40 = vector.multi_reduction <add>, %39, %cst_12 [0] : vector<32x128xf32> to vector<128xf32>
    %41 = vector.shape_cast %40 : vector<128xf32> to vector<1x128xf32>
    %42 = arith.mulf %39, %39 : vector<32x128xf32>
    %cst_13 = arith.constant dense<0.000000e+00> : vector<128xf32>
    %43 = vector.multi_reduction <add>, %42, %cst_13 [0] : vector<32x128xf32> to vector<128xf32>
    %44 = vector.shape_cast %43 : vector<128xf32> to vector<1x128xf32>
    %45 = tpu.concatenate %41, %44 in 0 : vector<1x128xf32>, vector<1x128xf32> -> vector<2x128xf32>
    %cst_14 = arith.constant dense<0.000000e+00> : vector<2x128xf32>
    %46 = tpu.matmul %45, %36, %cst_14 {dimension_numbers = #tpu.dot_dimension_numbers<[1], [0], [0], [1], [0, 0, 1, 1], [], []>} : vector<2x128xf32>, vector<128x128xf32>, vector<2x128xf32> -> vector<2x128xf32>
    %47 = vector.extract_strided_slice %46 {offsets = [0, 0], sizes = [1, 128], strides = [1, 1]} : vector<2x128xf32> to vector<1x128xf32>
    %cst_15 = arith.constant 0.001953125 : f32
    %48 = vector.broadcast %cst_15 : f32 to vector<1x128xf32>
    %49 = arith.mulf %47, %48 : vector<1x128xf32>
    %50 = vector.extract_strided_slice %46 {offsets = [1, 0], sizes = [1, 128], strides = [1, 1]} : vector<2x128xf32> to vector<1x128xf32>
    %cst_16 = arith.constant 0.001953125 : f32
    %51 = vector.broadcast %cst_16 : f32 to vector<1x128xf32>
    %52 = arith.mulf %50, %51 : vector<1x128xf32>
    %53 = arith.mulf %49, %49 : vector<1x128xf32>
    %54 = arith.subf %52, %53 : vector<1x128xf32>
    %55 = vector.broadcast %49 : vector<1x128xf32> to vector<32x128xf32>
    %56 = arith.subf %39, %55 : vector<32x128xf32>
    %cst_17 = arith.constant 9.99999974E-6 : f32
    %57 = vector.broadcast %cst_17 : f32 to vector<1x128xf32>
    %58 = arith.addf %54, %57 : vector<1x128xf32>
    %59 = math.rsqrt %58 : vector<1x128xf32>
    %60 = vector.broadcast %59 : vector<1x128xf32> to vector<32x128xf32>
    %61 = arith.mulf %56, %60 : vector<32x128xf32>
    %c0_18 = arith.constant 0 : index
    %c0_19 = arith.constant 0 : index
    %62 = vector.load %arg3[%c0_18, %c0_19] : memref<1x128xf32, #tpu.memory_space<vmem>>, vector<1x128xf32>
    %63 = vector.broadcast %62 : vector<1x128xf32> to vector<32x128xf32>
    %64 = arith.mulf %61, %63 : vector<32x128xf32>
    %c0_20 = arith.constant 0 : index
    %c0_21 = arith.constant 0 : index
    %65 = vector.load %arg4[%c0_20, %c0_21] : memref<1x128xf32, #tpu.memory_space<vmem>>, vector<1x128xf32>
    %66 = vector.broadcast %65 : vector<1x128xf32> to vector<32x128xf32>
    %67 = arith.addf %64, %66 : vector<32x128xf32>
    %68 = arith.negf %67 : vector<32x128xf32>
    %69 = math.exp %68 : vector<32x128xf32>
    %cst_22 = arith.constant 1.000000e+00 : f32
    %70 = vector.broadcast %cst_22 : f32 to vector<32x128xf32>
    %71 = arith.addf %70, %69 : vector<32x128xf32>
    %72 = arith.divf %70, %71 : vector<32x128xf32>
    %73 = arith.mulf %67, %72 : vector<32x128xf32>
    %74 = tpu.iota {dimensions = array<i32: 0>} : vector<32x128xi32>
    %c16_i32 = arith.constant 16 : i32
    %c0_i32_23 = arith.constant 0 : i32
    %75 = arith.cmpi eq, %c16_i32, %c0_i32_23 : i32
    %c1_i32_24 = arith.constant 1 : i32
    %76 = arith.select %75, %c1_i32_24, %c16_i32 : i32
    %77 = vector.broadcast %76 : i32 to vector<32x128xi32>
    %78 = arith.remsi %74, %77 : vector<32x128xi32>
    %c0_i32_25 = arith.constant 0 : i32
    %79 = vector.broadcast %c0_i32_25 : i32 to vector<32x128xi32>
    %80 = arith.cmpi ne, %78, %79 : vector<32x128xi32>
    %c0_i32_26 = arith.constant 0 : i32
    %81 = vector.broadcast %c0_i32_26 : i32 to vector<32x128xi32>
    %82 = arith.cmpi slt, %78, %81 : vector<32x128xi32>
    %c0_i32_27 = arith.constant 0 : i32
    %83 = arith.cmpi slt, %76, %c0_i32_27 : i32
    %84 = vector.broadcast %83 : i1 to vector<32x128xi1>
    %85 = vector.broadcast %84 : vector<32x128xi1> to vector<32x128xi1>
    %86 = arith.xori %82, %85 : vector<32x128xi1>
    %87 = arith.andi %86, %80 : vector<32x128xi1>
    %88 = vector.broadcast %76 : i32 to vector<32x128xi32>
    %89 = arith.addi %78, %88 : vector<32x128xi32>
    %90 = arith.select %87, %89, %78 : vector<32x128xi1>, vector<32x128xi32>
    %c0_i32_28 = arith.constant 0 : i32
    %91 = vector.broadcast %c0_i32_28 : i32 to vector<32x128xi32>
    %92 = arith.cmpi eq, %90, %91 : vector<32x128xi32>
    %c1_i32_29 = arith.constant 1 : i32
    %93 = tpu.dynamic_rotate %73 by %c1_i32_29 dim 0 : vector<32x128xf32>, i32 -> vector<32x128xf32>
    %cst_30 = arith.constant 0.000000e+00 : f32
    %94 = vector.broadcast %cst_30 : f32 to vector<32x128xf32>
    %95 = arith.select %92, %94, %93 : vector<32x128xi1>, vector<32x128xf32>
    %c15_i32 = arith.constant 15 : i32
    %96 = vector.broadcast %c15_i32 : i32 to vector<32x128xi32>
    %97 = arith.cmpi eq, %90, %96 : vector<32x128xi32>
    %c31_i32 = arith.constant 31 : i32
    %98 = tpu.dynamic_rotate %73 by %c31_i32 dim 0 : vector<32x128xf32>, i32 -> vector<32x128xf32>
    %cst_31 = arith.constant 0.000000e+00 : f32
    %99 = vector.broadcast %cst_31 : f32 to vector<32x128xf32>
    %100 = arith.select %97, %99, %98 : vector<32x128xi1>, vector<32x128xf32>
    tpu.wait_dma2 semaphore(%arg7 : memref<!tpu.dma_semaphore, #tpu.memory_space<semaphore_mem>>) src(%arg2 : memref<3x128x128xbf16, #tpu.memory_space<any>>) dst(%arg6 : memref<3x128x128xbf16, #tpu.memory_space<vmem>>)
    %101 = arith.truncf %95 : vector<32x128xf32> to vector<32x128xbf16>
    %c0_32 = arith.constant 0 : index
    %c0_33 = arith.constant 0 : index
    %c0_34 = arith.constant 0 : index
    %102 = vector.load %arg6[%c0_32, %c0_33, %c0_34] : memref<3x128x128xbf16, #tpu.memory_space<vmem>>, vector<1x128x128xbf16>
    %103 = vector.shape_cast %102 : vector<1x128x128xbf16> to vector<128x128xbf16>
    %cst_35 = arith.constant dense<0.000000e+00> : vector<32x128xf32>
    %104 = tpu.matmul %101, %103, %cst_35 {dimension_numbers = #tpu.dot_dimension_numbers<[1], [0], [0], [1], [0, 0, 1, 1], [], []>} : vector<32x128xbf16>, vector<128x128xbf16>, vector<32x128xf32> -> vector<32x128xf32>
    %105 = arith.truncf %73 : vector<32x128xf32> to vector<32x128xbf16>
    %c1 = arith.constant 1 : index
    %c0_36 = arith.constant 0 : index
    %c0_37 = arith.constant 0 : index
    %106 = vector.load %arg6[%c1, %c0_36, %c0_37] : memref<3x128x128xbf16, #tpu.memory_space<vmem>>, vector<1x128x128xbf16>
    %107 = vector.shape_cast %106 : vector<1x128x128xbf16> to vector<128x128xbf16>
    %cst_38 = arith.constant dense<0.000000e+00> : vector<32x128xf32>
    %108 = tpu.matmul %105, %107, %cst_38 {dimension_numbers = #tpu.dot_dimension_numbers<[1], [0], [0], [1], [0, 0, 1, 1], [], []>} : vector<32x128xbf16>, vector<128x128xbf16>, vector<32x128xf32> -> vector<32x128xf32>
    %109 = arith.addf %104, %108 : vector<32x128xf32>
    %110 = arith.truncf %100 : vector<32x128xf32> to vector<32x128xbf16>
    %c2 = arith.constant 2 : index
    %c0_39 = arith.constant 0 : index
    %c0_40 = arith.constant 0 : index
    %111 = vector.load %arg6[%c2, %c0_39, %c0_40] : memref<3x128x128xbf16, #tpu.memory_space<vmem>>, vector<1x128x128xbf16>
    %112 = vector.shape_cast %111 : vector<1x128x128xbf16> to vector<128x128xbf16>
    %cst_41 = arith.constant dense<0.000000e+00> : vector<32x128xf32>
    %113 = tpu.matmul %110, %112, %cst_41 {dimension_numbers = #tpu.dot_dimension_numbers<[1], [0], [0], [1], [0, 0, 1, 1], [], []>} : vector<32x128xbf16>, vector<128x128xbf16>, vector<32x128xf32> -> vector<32x128xf32>
    %114 = arith.addf %109, %113 : vector<32x128xf32>
    %cst_42 = arith.constant dense<0.000000e+00> : vector<128xf32>
    %115 = vector.multi_reduction <add>, %114, %cst_42 [0] : vector<32x128xf32> to vector<128xf32>
    %116 = vector.shape_cast %115 : vector<128xf32> to vector<1x128xf32>
    %117 = arith.mulf %114, %114 : vector<32x128xf32>
    %cst_43 = arith.constant dense<0.000000e+00> : vector<128xf32>
    %118 = vector.multi_reduction <add>, %117, %cst_43 [0] : vector<32x128xf32> to vector<128xf32>
    %119 = vector.shape_cast %118 : vector<128xf32> to vector<1x128xf32>
    %120 = tpu.concatenate %116, %119 in 0 : vector<1x128xf32>, vector<1x128xf32> -> vector<2x128xf32>
    %cst_44 = arith.constant dense<0.000000e+00> : vector<2x128xf32>
    %121 = tpu.matmul %120, %36, %cst_44 {dimension_numbers = #tpu.dot_dimension_numbers<[1], [0], [0], [1], [0, 0, 1, 1], [], []>} : vector<2x128xf32>, vector<128x128xf32>, vector<2x128xf32> -> vector<2x128xf32>
    %122 = vector.extract_strided_slice %121 {offsets = [0, 0], sizes = [1, 128], strides = [1, 1]} : vector<2x128xf32> to vector<1x128xf32>
    %cst_45 = arith.constant 0.001953125 : f32
    %123 = vector.broadcast %cst_45 : f32 to vector<1x128xf32>
    %124 = arith.mulf %122, %123 : vector<1x128xf32>
    %125 = vector.extract_strided_slice %121 {offsets = [1, 0], sizes = [1, 128], strides = [1, 1]} : vector<2x128xf32> to vector<1x128xf32>
    %cst_46 = arith.constant 0.001953125 : f32
    %126 = vector.broadcast %cst_46 : f32 to vector<1x128xf32>
    %127 = arith.mulf %125, %126 : vector<1x128xf32>
    %128 = arith.mulf %124, %124 : vector<1x128xf32>
    %129 = arith.subf %127, %128 : vector<1x128xf32>
    %130 = vector.broadcast %124 : vector<1x128xf32> to vector<32x128xf32>
    %131 = arith.subf %114, %130 : vector<32x128xf32>
    %cst_47 = arith.constant 9.99999974E-6 : f32
    %132 = vector.broadcast %cst_47 : f32 to vector<1x128xf32>
    %133 = arith.addf %129, %132 : vector<1x128xf32>
    %134 = math.rsqrt %133 : vector<1x128xf32>
    %135 = vector.broadcast %134 : vector<1x128xf32> to vector<32x128xf32>
    %136 = arith.mulf %131, %135 : vector<32x128xf32>
    %c0_48 = arith.constant 0 : index
    %c0_49 = arith.constant 0 : index
    %137 = vector.load %arg3[%c0_48, %c0_49] : memref<1x128xf32, #tpu.memory_space<vmem>>, vector<1x128xf32>
    %138 = vector.broadcast %137 : vector<1x128xf32> to vector<32x128xf32>
    %139 = arith.mulf %136, %138 : vector<32x128xf32>
    %c0_50 = arith.constant 0 : index
    %c0_51 = arith.constant 0 : index
    %140 = vector.load %arg4[%c0_50, %c0_51] : memref<1x128xf32, #tpu.memory_space<vmem>>, vector<1x128xf32>
    %141 = vector.broadcast %140 : vector<1x128xf32> to vector<32x128xf32>
    %142 = arith.addf %139, %141 : vector<32x128xf32>
    %143 = arith.negf %142 : vector<32x128xf32>
    %144 = math.exp %143 : vector<32x128xf32>
    %cst_52 = arith.constant 1.000000e+00 : f32
    %145 = vector.broadcast %cst_52 : f32 to vector<32x128xf32>
    %146 = arith.addf %145, %144 : vector<32x128xf32>
    %147 = arith.divf %145, %146 : vector<32x128xf32>
    %148 = arith.mulf %142, %147 : vector<32x128xf32>
    %c0_53 = arith.constant 0 : index
    %c0_54 = arith.constant 0 : index
    %149 = vector.load %arg5[%c0_53, %c0_54] : memref<32x128xf32, #tpu.memory_space<vmem>>, vector<32x128xf32>
    tpu.vector_store %arg5[%c0_53, %c0_54], %148 {strides = array<i32>} : memref<32x128xf32, #tpu.memory_space<vmem>>, vector<32x128xf32>,
    return
  }
}

</mosaic_0001>

<bundles_post_ra>
// kernel: tpu_custom_call.1
= control target key start
LH: loop header
LB: loop body
LE: loop exit
PB: predicated region body
PF: predicated region fallthrough
CT: control target
= control target key end

     0   :  { %10 = vsyncpa [#allocation5], 0  ;;  %s2189_s0 = inlined_call_operand.hbm [shape: bf16[32,192], index: 0, kind: input, shape index: {}]   ;;  %s2190_s1 = inlined_call_operand.hbm [shape: bf16[192,128], index: 1, kind: input, shape index: {}]   ;;  %s2191_s2 = inlined_call_operand.hbm [shape: bf16[3,128,128], index: 2, kind: input, shape index: {}]   ;;  %s2192_s3 = inlined_call_operand.vmem [shape: f32[1,128], index: 3, kind: input, shape index: {}]   ;;  %s2193_s4 = inlined_call_operand.vmem [shape: f32[1,128], index: 4, kind: input, shape index: {}]   ;;  %s2194_s5 = inlined_call_operand.hbm [shape: f32[32,128], index: 5, kind: output, shape index: {}]  }
   0x1   :  { %11 = vsyncpa [#allocation8], 0 }
   0x2   :  { %12 = vsyncpa [#allocation6], 0  ;;  %s1801_s18 = smov [#allocation4]  }
   0x3   :  { %s18_s19 = sshll.u32 %s1801_s18, 4  ;;  %s19_s19 = int_to_ptr.vmem [resolvable:$true] %s18_s19 }
   0x4   :  { %s1721_s20 = scalar_lea.vmem %s19_s19, 512  ;;  %p1726_p1 = scmp.lt.s32.totalorder %s19_s19, %s19_s19 }
   0x5   :  { %p1722_p0 = scmp.ne.s32.totalorder %s19_s19, %s1721_s20  ;;  %p1727_p2 = scmp.lt.s32.totalorder %s1721_s20, %s1721_s20 }
   0x7   :  { %p1728_p3 = por %p1727_p2, %p1726_p1 }
   0x9   :  { %p1729_p4 = pnand %p1728_p3, %p1722_p0 }
   0xb   :  { %1732 = shalt.err (!%p1729_p4)
}
   0xc   :  { %s1802_s21 = smov 128   ;;  %s1803_s22 = smov 8  }
   0xd   :  { %24 = dma.hbm_to_vmem [thread:$0]  %s2189_s0, 512, %s19_s19, [#allocation5], %s1802_s21, %s1802_s21, %s1803_s22  }
   0xe   :  { %s1804_s25 = smov [#allocation7]  }
   0xf   :  { %s30_s26 = sshll.u32 %s1804_s25, 4  ;;  %s31_s26 = int_to_ptr.vmem [resolvable:$true] %s30_s26 }
  0x10   :  { %s1741_s27 = scalar_lea.vmem %s31_s26, 1536  ;;  %p1746_p6 = scmp.lt.s32.totalorder %s31_s26, %s31_s26 }
  0x11   :  { %p1742_p5 = scmp.ne.s32.totalorder %s31_s26, %s1741_s27  ;;  %p1747_p7 = scmp.lt.s32.totalorder %s1741_s27, %s1741_s27 }
  0x13   :  { %p1748_p8 = por %p1747_p7, %p1746_p6 }
  0x15   :  { %p1749_p9 = pnand %p1748_p8, %p1742_p5 }
  0x17   :  { %1752 = shalt.err (!%p1749_p9)
}
  0x18   :  { %s1805_s28 = smov 64   ;;  %s1806_s29 = smov 4  }
  0x19   :  { %36 = dma.hbm_to_vmem [thread:$0]  %s2190_s1, 1536, %s31_s26, [#allocation8], %s1805_s28, %s1805_s28, %s1806_s29  }
  0x1a   :  { %1793 = dma.done.wait [#allocation5], 512  }
  0x1b   :  { %1794 = vsyncadd [#allocation5], 4294966784 }
  0x1c   :  { %1795 = dma.done.wait [#allocation8], 1536  }
  0x1d   :  { %1796 = vsyncadd [#allocation8], 4294965760  ;;  %v59_v0 = vlaneseq  ;;  %v1807_v1 = vmov 0   ;;  %v1808_v2 = vmov 0.0   ;;  %v1635_v9 = vld [vmem:[#allocation7 + $0x38] sm:$0xff]   ;;  %v1636_v11 = vld [vmem:[#allocation7 + $0x30] sm:$0xff]  }
  0x1e   :  { %455 = vmatprep.subr.bf16.mxu0 %v1807_v1  ;;  %1492 = vmatprep.subr.mxu1 %v1808_v2  ;;  %v1809_v12 = vmov 1.0   ;;  %v1637_v13 = vld [vmem:[#allocation7 + $0x28] sm:$0xff]   ;;  %v1638_v14 = vld [vmem:[#allocation7 + $0x20] sm:$0xff]   ;;  %vm448_vm1 = vcmask 523264   ;;  %v1639_v16 = vld [vmem:[#allocation7 + $0x18] sm:$0xff]   ;;  %v2224_v60 = vmov 0 }
  0x1f   :  { %v1854_v3 = vshrl.u32 %v59_v0, 7  ;;  %v269_v4 = vand.u32 127, %v59_v0  ;;  %456 = vmatpush1.bf16.msra.mxu0 %v1635_v9  ;;  %v1649_v15 = vld [vmem:[#allocation4 + $0x4] ss:$8 sps:$4 sm:$0xff]   ;;  %v1640_v17 = vld [vmem:[#allocation7 + $0x10] sm:$0xff]   ;;  %v1643_v20 = vld [vmem:[#allocation7 + $0x58] sm:$0xff]  }
  0x20   :  { %457 = vmatprep.subr.bf16.mxu0 %v1807_v1  ;;  %1337 = vmatprep.mubr.msk.bf16.mxu0 %vm448_vm1, %v1649_v15  ;;  %v1641_v18 = vld [vmem:[#allocation7 + $0x8] sm:$0xff]   ;;  %v1642_v19 = vld [vmem:[#allocation7] sm:$0xff]   ;;  %v1644_v21 = vld [vmem:[#allocation7 + $0x50] sm:$0xff]   ;;  %vm2195_vm14 = vmmov 0   ;;  %v2232_v15 = vmov 0  ;;  %s1811_s0 = smov [#allocation2]  }
  0x21   :  { %v75_v5 = vadd.s32 120, %v1854_v3  ;;  %v1857_v6 = vand.u32 7, %v269_v4  ;;  %v676_v7 = vand.u32 15, %v1854_v3  ;;  %v1645_v22 = vld [vmem:[#allocation7 + $0x48] sm:$0xff]   ;;  %v1646_v23 = vld [vmem:[#allocation7 + $0x40] sm:$0xff]   ;;  %v74_v27 = vadd.s32 112, %v1854_v3  ;;  %1524 = vmatprep.mubr.msk.f32.mxu1 %vm2195_vm14, %v1808_v2 }
  0x22   :  { %v1647_v24 = vld [vmem:[#allocation4] ss:$8 sps:$4 sm:$0xff]   ;;  %v1650_v25 = vld [vmem:[#allocation4 + $0x14] ss:$8 sps:$4 sm:$0xff]   ;;  %v1652_v26 = vld [vmem:[#allocation4 + $0x10] ss:$8 sps:$4 sm:$0xff]  }
  0x23   :  { %v185_v8 = vand.u32 7, %v75_v5  ;;  %458 = vmatpush1.bf16.msra.mxu0 %v1636_v11  ;;  %v178_v28 = vand.u32 7, %v74_v27  ;;  %v73_v29 = vadd.s32 104, %v1854_v3  ;;  %v72_v32 = vadd.s32 96, %v1854_v3  ;;  %s55_s1 = sshll.u32 %s1811_s0, 4  ;;  %s56_s1 = int_to_ptr.vmem [resolvable:$true] %s55_s1 }
  0x24   :  { %459 = vmatprep.subr.bf16.mxu0 %v1807_v1  ;;  %v71_v35 = vadd.s32 88, %v1854_v3  ;;  %v70_v38 = vadd.s32 80, %v1854_v3  ;;  %v69_v41 = vadd.s32 72, %v1854_v3  ;;  %v68_v44 = vadd.s32 64, %v1854_v3  ;;  %s1761_s7 = scalar_lea.vmem %s56_s1, 3072  ;;  %p1766_p11 = scmp.lt.s32.totalorder %s56_s1, %s56_s1 }
  0x25   :  { %vm1861_vm0 = vcmp.eq.s32.totalorder %v185_v8, %v1857_v6  ;;  %vm1874_vm2 = vcmp.eq.s32.totalorder %v178_v28, %v1857_v6  ;;  %v171_v31 = vand.u32 7, %v73_v29  ;;  %v164_v34 = vand.u32 7, %v72_v32  ;;  %p1762_p10 = scmp.ne.s32.totalorder %s56_s1, %s1761_s7  ;;  %p1767_p12 = scmp.lt.s32.totalorder %s1761_s7, %s1761_s7 }
  0x26   :  { %1493 = vmatpush3.msk.msra.mxu1 %vm1861_vm0, %v1809_v12  ;;  %v157_v37 = vand.u32 7, %v71_v35  ;;  %v150_v40 = vand.u32 7, %v70_v38  ;;  %v143_v43 = vand.u32 7, %v69_v41  ;;  %v136_v46 = vand.u32 7, %v68_v44 }
  0x27   :  { %1494 = vmatprep.subr.mxu1 %v1808_v2  ;;  %460 = vmatpush1.bf16.msra.mxu0 %v1637_v13  ;;  %vm1884_vm3 = vcmp.eq.s32.totalorder %v171_v31, %v1857_v6  ;;  %vm1894_vm4 = vcmp.eq.s32.totalorder %v164_v34, %v1857_v6  ;;  %v67_v47 = vadd.s32 56, %v1854_v3  ;;  %v66_v50 = vadd.s32 48, %v1854_v3  ;;  %p1768_p13 = por %p1767_p12, %p1766_p11 }
  0x28   :  { %461 = vmatprep.subr.bf16.mxu0 %v1807_v1  ;;  %1495 = vmatpush3.msk.msra.mxu1 %vm1874_vm2, %v1809_v12  ;;  %vm1904_vm5 = vcmp.eq.s32.totalorder %v157_v37, %v1857_v6  ;;  %vm1914_vm6 = vcmp.eq.s32.totalorder %v150_v40, %v1857_v6  ;;  %vm1924_vm7 = vcmp.eq.s32.totalorder %v143_v43, %v1857_v6  ;;  %v65_v53 = vadd.s32 40, %v1854_v3 }
  0x29   :  { %1496 = vmatprep.subr.mxu1 %v1808_v2  ;;  %vm1934_vm8 = vcmp.eq.s32.totalorder %v136_v46, %v1857_v6  ;;  %v129_v49 = vand.u32 7, %v67_v47  ;;  %v122_v52 = vand.u32 7, %v66_v50  ;;  %v64_v56 = vadd.s32 32, %v1854_v3  ;;  %p1769_p0 = pnand %p1768_p13, %p1762_p10 }
  0x2a   :  { %1497 = vmatpush3.msk.msra.mxu1 %vm1884_vm3, %v1809_v12  ;;  %v115_v55 = vand.u32 7, %v65_v53  ;;  %v1969_v59 = vadd.s32 24, %v1854_v3  ;;  %v1982_v62 = vadd.s32 16, %v1854_v3  ;;  %v1989_v0 = vadd.s32 8, %v1854_v3 }
  0x2b   :  { %462 = vmatpush1.bf16.msra.mxu0 %v1638_v14  ;;  %1498 = vmatprep.subr.mxu1 %v1808_v2  ;;  %vm1944_vm9 = vcmp.eq.s32.totalorder %v129_v49, %v1857_v6  ;;  %vm1954_vm10 = vcmp.eq.s32.totalorder %v122_v52, %v1857_v6  ;;  %v108_v58 = vand.u32 7, %v64_v56  ;;  %v80_v8 = vand.u32 7, %v1854_v3 }
  0x2c   :  { %463 = vmatprep.subr.bf16.mxu0 %v1807_v1  ;;  %1499 = vmatpush3.msk.msra.mxu1 %vm1894_vm4, %v1809_v12  ;;  %vm1964_vm11 = vcmp.eq.s32.totalorder %v115_v55, %v1857_v6  ;;  %v101_v61 = vand.u32 7, %v1969_v59  ;;  %v697_v63 = vand.u32 15, %v1969_v59  ;;  %v94_v4 = vand.u32 7, %v1982_v62 }
  0x2d   :  { %1500 = vmatprep.subr.mxu1 %v1808_v2  ;;  %vm1976_vm12 = vcmp.eq.s32.totalorder %v108_v58, %v1857_v6  ;;  %v690_v5 = vand.u32 15, %v1982_v62  ;;  %v87_v9 = vand.u32 7, %v1989_v0  ;;  %v683_v11 = vand.u32 15, %v1989_v0 }
  0x2e   :  { %1501 = vmatpush3.msk.msra.mxu1 %vm1904_vm5, %v1809_v12  ;;  %v2225_v60 = vsel %vm1976_vm12, 4294967295, %v2224_v60  ;;  %vm1993_vm13 = vcmp.eq.s32.totalorder %v101_v61, %v1857_v6  ;;  %vm2009_vm15 = vcmp.eq.s32.totalorder %v94_v4, %v1857_v6  ;;  %v2228_v13 = vmov 0 }
  0x2f   :  { %464 = vmatpush1.bf16.msra.mxu0 %v1639_v16  ;;  %1502 = vmatprep.subr.mxu1 %v1808_v2  ;;  %v2229_v13 = vsel %vm2009_vm15, 4294967295, %v2228_v13  ;;  %v2230_v14 = vmov 0  ;;  %vm2023_vm14 = vcmp.eq.s32.totalorder %v80_v8, %v1857_v6 }
  0x30   :  { %465 = vmatprep.subr.bf16.mxu0 %v1807_v1  ;;  %1503 = vmatpush3.msk.msra.mxu1 %vm1914_vm6, %v1809_v12  ;;  %v2233_v15 = vsel %vm2023_vm14, 4294967295, %v2232_v15 }
  0x31   :  { %1504 = vmatprep.subr.mxu1 %v1808_v2 }
  0x32   :  { %1505 = vmatpush3.msk.msra.mxu1 %vm1924_vm7, %v1809_v12 }
  0x33   :  { %466 = vmatpush1.bf16.msra.mxu0 %v1640_v17  ;;  %1506 = vmatprep.subr.mxu1 %v1808_v2 }
  0x34   :  { %467 = vmatprep.subr.bf16.mxu0 %v1807_v1  ;;  %1507 = vmatpush3.msk.msra.mxu1 %vm1934_vm8, %v1809_v12 }
  0x35   :  { %1508 = vmatprep.subr.mxu1 %v1808_v2 }
  0x36   :  { %1509 = vmatpush3.msk.msra.mxu1 %vm1944_vm9, %v1809_v12 }
  0x37   :  { %468 = vmatpush1.bf16.msra.mxu0 %v1641_v18  ;;  %1510 = vmatprep.subr.mxu1 %v1808_v2 }
  0x38   :  { %469 = vmatprep.subr.bf16.mxu0 %v1807_v1  ;;  %1511 = vmatpush3.msk.msra.mxu1 %vm1954_vm10, %v1809_v12 }
  0x39   :  { %1512 = vmatprep.subr.mxu1 %v1808_v2 }
  0x3a   :  { %1513 = vmatpush3.msk.msra.mxu1 %vm1964_vm11, %v1809_v12 }
  0x3b   :  { %470 = vmatpush1.bf16.msra.mxu0 %v1642_v19  ;;  %1514 = vmatprep.subr.mxu1 %v1808_v2 }
  0x3c   :  { %479 = vmatprep.subr.bf16.mxu0 %v1807_v1  ;;  %1515 = vmatpush3.msk.msra.mxu1 %vm1976_vm12, %v1809_v12 }
  0x3d   :  { %1516 = vmatprep.subr.mxu1 %v1808_v2 }
  0x3e   :  { %1517 = vmatpush3.msk.msra.mxu1 %vm1993_vm13, %v1809_v12 }
  0x3f   :  { %480 = vmatpush2.bf16.msra.mxu0 %v1643_v20  ;;  %1518 = vmatprep.subr.mxu1 %v1808_v2 }
  0x40   :  { %481 = vmatprep.subr.bf16.mxu0 %v1807_v1  ;;  %1519 = vmatpush3.msk.msra.mxu1 %vm2009_vm15, %v1809_v12 }
  0x41   :  { %1520 = vmatprep.subr.mxu1 %v1808_v2 }
  0x43   :  { %482 = vmatpush2.bf16.msra.mxu0 %v1644_v21 }
  0x44   :  { %483 = vmatprep.subr.bf16.mxu0 %v1807_v1 }
  0x47   :  { %484 = vmatpush2.bf16.msra.mxu0 %v1645_v22 }
  0x48   :  { %485 = vmatprep.subr.bf16.mxu0 %v1807_v1  ;;  %v2226_v1 = vmov 0 }
  0x49   :  { %v2227_v1 = vsel %vm1993_vm13, 4294967295, %v2226_v1 }
  0x4b   :  { %486 = vmatpush2.bf16.msra.mxu0 %v1646_v23 }
  0x4e   :  { %488 = vmatmul.mubr.bf16.vlgmr.msra.gmra.mxu0 %v1647_v24 }
  0x4f   :  { %1338 = vmatprep.mubr.msk.bf16.mxu0 %vm448_vm1, %v1650_v25  ;;  %vm2017_vm1 = vcmp.eq.s32.totalorder %v87_v9, %v1857_v6 }
  0x50   :  { %v2231_v14 = vsel %vm2017_vm1, 4294967295, %v2230_v14  ;;  %1521 = vmatpush3.msk.msra.mxu1 %vm2017_vm1, %v1809_v12 }
  0x51   :  { %1522 = vmatprep.subr.mxu1 %v1808_v2 }
  0x52   :  { %1523 = vmatpush3.msk.msra.mxu1 %vm2023_vm14, %v1809_v12  ;;  %vm2197_vm14 = vcmask 1040384  }
  0x56   :  { %496 = vmatmul.mubr.bf16.gmra.mxu0 %v1652_v26 }
 0x10e   :  { %v2034_v16 = vpop.f32.mrf.mxu0 }
 0x10f   :  { %v513_v21 = vmul.f32 %v2034_v16, %v2034_v16 }
 0x110   :  { %v491_v17 = vpop.f32.mrf.mxu0 }
 0x112   :  { %v492_v18 = vpop.f32.mrf.mxu0 }
 0x113   :  { %v514_v20 = vmul.f32 %v492_v18, %v492_v18  ;;  %v504_v22 = vadd.f32 %v492_v18, %v2034_v16 }
 0x114   :  { %v494_v19 = vpop.f32.mrf.mxu0 }
 0x115   :  { %v517_v25 = vadd.f32 %v514_v20, %v513_v21 }
 0x116   :  { %v497_v6 = vpop.f32.mrf.mxu0 }
 0x117   :  { %v515_v23 = vmul.f32 %v497_v6, %v497_v6  ;;  %v505_v26 = vadd.f32 %v504_v22, %v497_v6 }
 0x118   :  { %v499_v24 = vpop.f32.mrf.mxu0 }
 0x119   :  { %v518_v28 = vadd.f32 %v517_v25, %v515_v23 }
 0x11a   :  { %v500_v27 = vpop.f32.mrf.mxu0 }
 0x11b   :  { %v506_v29 = vadd.f32 %v505_v26, %v500_v27  ;;  %v516_v31 = vmul.f32 %v500_v27, %v500_v27 }
 0x11c   :  { %v502_v32 = vpop.f32.mrf.mxu0 }
 0x11d   :  { %v507_v34 = vrot.slane %v506_v29, 4  ;;  %v519_v35 = vadd.f32 %v518_v28, %v516_v31 }
 0x11f   :  { %v508_v37 = vadd.f32 %v507_v34, %v506_v29  ;;  %v520_v38 = vrot.slane %v519_v35, 4 }
 0x121   :  { %v509_v40 = vrot.slane %v508_v37, 2  ;;  %v521_v41 = vadd.f32 %v520_v38, %v519_v35 }
 0x123   :  { %v510_v43 = vadd.f32 %v509_v40, %v508_v37  ;;  %v522_v44 = vrot.slane %v521_v41, 2 }
 0x125   :  { %v511_v46 = vrot.slane %v510_v43, 1  ;;  %v523_v47 = vadd.f32 %v522_v44, %v521_v41 }
 0x127   :  { %v524_v49 = vrot.slane %v523_v47, 1  ;;  %v512_v50 = vadd.f32 %v511_v46, %v510_v43 }
 0x129   :  { %v525_v52 = vadd.f32 %v524_v49, %v523_v47 }
 0x12b   :  { %v527_v53 = vsel %vm2197_vm14, %v512_v50, %v525_v52 }
 0x12c   :  { %1525 = vmatmul.mubr.f32.vlgmr.msra.gmra.mxu1 %v527_v53 }
 0x12d   :  { %1772 = shalt.err (!%p1769_p0)  }
 0x12e   :  { %58 = dma.hbm_to_vmem [thread:$0]  %s2191_s2, 3072, %s56_s1, [#allocation3]  ;;  %v606_v17 = vsub.s32 0, %v1854_v3  ;;  %v616_v20 = vsub.s32 1, %v1854_v3  ;;  %v1355_v28 = vld [vmem:[%s2192_s3] ss:$0 sm:$0xff] }
 0x12f   :  { %v1356_v35 = vld [vmem:[%s2193_s4] ss:$0 sm:$0xff]  ;;  %vm728_vm14 = vcmp.lt.s32.totalorder %v1854_v3, 1  ;;  %vm745_vm1 = vcmp.lt.s32.totalorder %v1854_v3, 7 }
 0x1ec   :  { %v594_v55 = vpop.f32.mrf.mxu1 }
 0x1ed   :  { %v598_v56 = vmul.f32 0.001953125, %v594_v55 }
 0x1ee   :  { %v1526_v58 = vpop.f32.mrf.mxu1 }
 0x1ef   :  { %v599_v61 = vmul.f32 %v598_v56, %v598_v56  ;;  %v607_v19 = vrot.slane %v598_v56, %v606_v17 }
 0x1f1   :  { %v601_v4 = vrot.slane %v599_v61, 7  ;;  %v608_v22 = vsub.f32 %v2034_v16, %v607_v19  ;;  %v609_v23 = vsub.f32 %v492_v18, %v607_v19  ;;  %v610_v24 = vsub.f32 %v497_v6, %v607_v19 }
 0x1f2   :  { %v611_v25 = vsub.f32 %v500_v27, %v607_v19 }
 0x1f3   :  { %v603_v8 = vsub.f32 %v598_v56, %v601_v4 }
 0x1f5   :  { %v612_v9 = vadd.f32 1e-05, %v603_v8 }
 0x1f7   :  { %1653 = vrsqrt.f32 %v612_v9 }
 0x204   :  { %v1654_v21 = vpop.eup %1653 }
 0x205   :  { %v617_v26 = vrot.slane %v1654_v21, %v616_v20 }
 0x207   :  { %v618_v29 = vmul.f32 %v617_v26, %v608_v22  ;;  %v619_v31 = vmul.f32 %v617_v26, %v609_v23  ;;  %v620_v32 = vmul.f32 %v617_v26, %v610_v24  ;;  %v621_v34 = vmul.f32 %v617_v26, %v611_v25 }
 0x209   :  { %v629_v37 = vmul.f32 %v1355_v28, %v618_v29  ;;  %v630_v16 = vmul.f32 %v1355_v28, %v619_v31  ;;  %v631_v18 = vmul.f32 %v1355_v28, %v620_v32  ;;  %v632_v6 = vmul.f32 %v1355_v28, %v621_v34 }
 0x20b   :  { %v640_v27 = vadd.f32 %v1356_v35, %v629_v37  ;;  %v641_v38 = vadd.f32 %v1356_v35, %v630_v16  ;;  %v642_v40 = vadd.f32 %v1356_v35, %v631_v18  ;;  %v643_v41 = vadd.f32 %v1356_v35, %v632_v6 }
 0x20d   :  { %v1357_v43 = vmul.f32 -1.442695, %v640_v27  ;;  %v1358_v44 = vmul.f32 -1.442695, %v641_v38  ;;  %v1359_v46 = vmul.f32 -1.442695, %v642_v40 }
 0x20e   :  { %v1360_v47 = vmul.f32 -1.442695, %v643_v41 }
 0x20f   :  { %1655 = vpow2.f32 %v1357_v43 }
 0x210   :  { %1657 = vpow2.f32 %v1358_v44 }
 0x211   :  { %1659 = vpow2.f32 %v1359_v46 }
 0x212   :  { %1661 = vpow2.f32 %v1360_v47 }
 0x21c   :  { %v1656_v49 = vpop.eup %1655 }
 0x21d   :  { %v1658_v50 = vpop.eup %1657  ;;  %v656_v52 = vadd.f32 1.0, %v1656_v49 }
 0x21e   :  { %v1660_v53 = vpop.eup %1659  ;;  %v657_v55 = vadd.f32 1.0, %v1658_v50 }
 0x21f   :  { %v1662_v56 = vpop.eup %1661  ;;  %v658_v58 = vadd.f32 1.0, %v1660_v53  ;;  %1663 = vrcp.f32 %v656_v52 }
 0x220   :  { %v659_v61 = vadd.f32 1.0, %v1662_v56  ;;  %1665 = vrcp.f32 %v657_v55 }
 0x221   :  { %1667 = vrcp.f32 %v658_v58 }
 0x222   :  { %1669 = vrcp.f32 %v659_v61 }
 0x22c   :  { %v1664_v4 = vpop.eup %1663 }
 0x22d   :  { %v1666_v8 = vpop.eup %1665  ;;  %v668_v9 = vmul.f32 %v1664_v4, %v640_v27 }
 0x22e   :  { %v1668_v19 = vpop.eup %1667  ;;  %v669_v21 = vmul.f32 %v1666_v8, %v641_v38 }
 0x22f   :  { %v1670_v22 = vpop.eup %1669  ;;  %v2057_v23 = vmul.f32 %v1668_v19, %v642_v40  ;;  %v724_v24 = vrot.slane %v668_v9, 7  ;;  %v741_v25 = vrot.slane %v668_v9, 1 }
 0x230   :  { %v2060_v26 = vmul.f32 %v1670_v22, %v643_v41  ;;  %v725_v28 = vrot.slane %v669_v21, 7  ;;  %v742_v29 = vrot.slane %v669_v21, 1 }
 0x231   :  { %v726_v31 = vrot.slane %v2057_v23, 7  ;;  %v743_v32 = vrot.slane %v2057_v23, 1 }
 0x232   :  { %v727_v34 = vrot.slane %v2060_v26, 7  ;;  %v731_v35 = vsel %vm728_vm14, %v724_v24, %v725_v28  ;;  %v744_v37 = vrot.slane %v2060_v26, 1  ;;  %v2068_v16 = vsel %vm745_vm1, %v741_v25, %v742_v29 }
 0x233   :  { %v2072_v18 = vsel %vm728_vm14, %v725_v28, %v726_v31  ;;  %v2074_v6 = vsel %vm745_vm1, %v742_v29, %v743_v32 }
 0x234   :  { %v2078_v27 = vsel %vm728_vm14, %v726_v31, %v727_v34  ;;  %v732_v38 = vsel %vm728_vm14, %v727_v34, %v724_v24  ;;  %v2082_v40 = vsel %vm745_vm1, %v743_v32, %v744_v37  ;;  %v2084_v41 = vsel %vm745_vm1, %v744_v37, %v741_v25 }
 0x235   :  { %1797 = dma.done.wait [#allocation3], 3072 }
 0x236   :  { %1798 = vsyncadd [#allocation3], 4294964224  ;;  %v777_v43 = vpack.c.bf16 %v669_v21, %v668_v9  ;;  %vm1424_vm15 = vcmp.ne.s32.totalorder %v676_v7, 0  ;;  %v1379_v44 = vpack.c.bf16 %v731_v35, %v732_v38  ;;  %vm1812_vm13 = vmmov 1   ;;  %v1671_v46 = vld [vmem:[#allocation2 + $0x78] sm:$0xff]   ;;  %v1673_v49 = vld [vmem:[#allocation2 + $0x70] sm:$0xff]  }
 0x237   :  { %vm1378_vm12 = vmpackc.low %vm1812_vm13, %vm1424_vm15  ;;  %v1672_v47 = vld [vmem:[#allocation2 + $0x38] sm:$0xff]   ;;  %1527 = vmatprep.subr.bf16.mxu1 %v1671_v46  ;;  %v1674_v50 = vld [vmem:[#allocation2 + $0x30] sm:$0xff]   ;;  %v778_v24 = vpack.c.bf16 %v2060_v26, %v2057_v23  ;;  %vm1426_vm14 = vcmp.ne.s32.totalorder %v683_v11, 15  ;;  %v1383_v25 = vpack.c.bf16 %v2078_v27, %v2072_v18  ;;  %v1395_v29 = vpack.c.bf16 %v2074_v6, %v2068_v16 }
 0x238   :  { %1543 = vmatprep.mubr.bf16.mxu1 %v777_v43  ;;  %1563 = vmatprep.mubr.msk.bf16.mxu0 %vm1378_vm12, %v1379_v44  ;;  %v1675_v52 = vld [vmem:[#allocation2 + $0x68] sm:$0xff]   ;;  %v1677_v7 = vld [vmem:[#allocation2 + $0x60] sm:$0xff]   ;;  %v1679_v56 = vld [vmem:[#allocation2 + $0x58] sm:$0xff]   ;;  %vm1425_vm12 = vcmp.ne.s32.totalorder %v690_v5, 0  ;;  %v1399_v39 = vpack.c.bf16 %v2084_v41, %v2082_v40 }
 0x239   :  { %1547 = vmatprep.subr.bf16.mxu0 %v1672_v47  ;;  %1528 = vmatpush3.bf16.msra.mxu1 %v1671_v46  ;;  %v1676_v53 = vld [vmem:[#allocation2 + $0x28] sm:$0xff]   ;;  %v1678_v55 = vld [vmem:[#allocation2 + $0x20] sm:$0xff]   ;;  %v1680_v58 = vld [vmem:[#allocation2 + $0x18] sm:$0xff]  }
 0x23a   :  { %1548 = vmatpush3.bf16.msra.mxu0 %v1672_v47  ;;  %1529 = vmatprep.subr.bf16.mxu1 %v1673_v49  ;;  %v1681_v61 = vld [vmem:[#allocation2 + $0x50] sm:$0xff]   ;;  %v1683_v8 = vld [vmem:[#allocation2 + $0x48] sm:$0xff]   ;;  %v1685_v19 = vld [vmem:[#allocation2 + $0x40] sm:$0xff]  }
 0x23b   :  { %1549 = vmatprep.subr.bf16.mxu0 %v1674_v50  ;;  %v1682_v4 = vld [vmem:[#allocation2 + $0x10] sm:$0xff]   ;;  %v1684_v9 = vld [vmem:[#allocation2 + $0x8] sm:$0xff]   ;;  %v1686_v21 = vld [vmem:[#allocation2] sm:$0xff]  }
 0x23c   :  { %v1687_v22 = vld [vmem:[#allocation2 + $0xb8] sm:$0xff]   ;;  %vm1382_vm15 = vmpackc.low %vm1812_vm13, %vm1425_vm12  ;;  %v1688_v28 = vld [vmem:[#allocation2 + $0xb0] sm:$0xff]   ;;  %vm2234_vm12 = vmmov 0  }
 0x23d   :  { %1530 = vmatpush3.bf16.msra.mxu1 %v1673_v49  ;;  %vm1394_vm1 = vmpackc.low %vm1426_vm14, %vm1812_vm13  ;;  %v1689_v62 = vld [vmem:[#allocation2 + $0xa8] sm:$0xff]   ;;  %v1690_v0 = vld [vmem:[#allocation2 + $0xa0] sm:$0xff]  }
 0x23e   :  { %1550 = vmatpush3.bf16.msra.mxu0 %v1674_v50  ;;  %1531 = vmatprep.subr.bf16.mxu1 %v1675_v52  ;;  %v1691_v10 = vld [vmem:[#allocation2 + $0x98] sm:$0xff]   ;;  %v1692_v30 = vld [vmem:[#allocation2 + $0x90] sm:$0xff]   ;;  %v1693_v33 = vld [vmem:[#allocation2 + $0x88] sm:$0xff]  }
 0x23f   :  { %1551 = vmatprep.subr.bf16.mxu0 %v1676_v53  ;;  %v1694_v36 = vld [vmem:[#allocation2 + $0x80] sm:$0xff]  }
 0x241   :  { %1532 = vmatpush3.bf16.msra.mxu1 %v1675_v52 }
 0x242   :  { %1552 = vmatpush3.bf16.msra.mxu0 %v1676_v53  ;;  %1533 = vmatprep.subr.bf16.mxu1 %v1677_v7 }
 0x243   :  { %1553 = vmatprep.subr.bf16.mxu0 %v1678_v55 }
 0x245   :  { %1534 = vmatpush3.bf16.msra.mxu1 %v1677_v7 }
 0x246   :  { %1554 = vmatpush3.bf16.msra.mxu0 %v1678_v55  ;;  %1535 = vmatprep.subr.bf16.mxu1 %v1679_v56 }
 0x247   :  { %1555 = vmatprep.subr.bf16.mxu0 %v1680_v58 }
 0x249   :  { %1536 = vmatpush3.bf16.msra.mxu1 %v1679_v56 }
 0x24a   :  { %1556 = vmatpush3.bf16.msra.mxu0 %v1680_v58  ;;  %1537 = vmatprep.subr.bf16.mxu1 %v1681_v61 }
 0x24b   :  { %1557 = vmatprep.subr.bf16.mxu0 %v1682_v4 }
 0x24d   :  { %1538 = vmatpush3.bf16.msra.mxu1 %v1681_v61 }
 0x24e   :  { %1558 = vmatpush3.bf16.msra.mxu0 %v1682_v4  ;;  %1539 = vmatprep.subr.bf16.mxu1 %v1683_v8 }
 0x24f   :  { %1559 = vmatprep.subr.bf16.mxu0 %v1684_v9 }
 0x251   :  { %1540 = vmatpush3.bf16.msra.mxu1 %v1683_v8 }
 0x252   :  { %1560 = vmatpush3.bf16.msra.mxu0 %v1684_v9  ;;  %1541 = vmatprep.subr.bf16.mxu1 %v1685_v19 }
 0x253   :  { %1561 = vmatprep.subr.bf16.mxu0 %v1686_v21 }
 0x255   :  { %1542 = vmatpush3.bf16.msra.mxu1 %v1685_v19 }
 0x256   :  { %1562 = vmatpush3.bf16.msra.mxu0 %v1686_v21  ;;  %1567 = vmatprep.subr.bf16.mxu1 %v1687_v22 }
 0x257   :  { %1587 = vmatprep.subr.mxu0 %v1808_v2 }
 0x258   :  { %1544 = vmatmul.mubr.bf16.vlgmr.msra.gmra.mxu1 %v778_v24 }
 0x259   :  { %1564 = vmatmul.mubr.msk.bf16.vlgmr.msra.gmra.mxu0 %vm1382_vm15, %v1383_v25  ;;  %1568 = vmatpush3.bf16.msra.mxu1 %v1687_v22 }
 0x25a   :  { %1569 = vmatprep.subr.bf16.mxu1 %v1688_v28  ;;  %1583 = vmatprep.mubr.msk.bf16.mxu1 %vm1394_vm1, %v1395_v29 }
 0x25b   :  { %1588 = vmatpush3.msk.msra.mxu0 %vm1861_vm0, %v1809_v12  ;;  %1619 = vmatprep.mubr.msk.f32.mxu0 %vm2234_vm12, %v1808_v2  ;;  %vm2235_vm0 = vnez %v2225_v60 }
 0x25c   :  { %1589 = vmatprep.subr.mxu0 %v1808_v2 }
 0x25d   :  { %1570 = vmatpush3.bf16.msra.mxu1 %v1688_v28  ;;  %1590 = vmatpush3.msk.msra.mxu0 %vm1874_vm2, %v1809_v12  ;;  %vm1427_vm2 = vcmp.ne.s32.totalorder %v697_v63, 15 }
 0x25e   :  { %1571 = vmatprep.subr.bf16.mxu1 %v1689_v62  ;;  %1591 = vmatprep.subr.mxu0 %v1808_v2 }
 0x25f   :  { %1592 = vmatpush3.msk.msra.mxu0 %vm1884_vm3, %v1809_v12  ;;  %vm2236_vm3 = vnez %v2227_v1 }
 0x260   :  { %1593 = vmatprep.subr.mxu0 %v1808_v2 }
 0x261   :  { %1572 = vmatpush3.bf16.msra.mxu1 %v1689_v62  ;;  %1594 = vmatpush3.msk.msra.mxu0 %vm1894_vm4, %v1809_v12  ;;  %vm1398_vm4 = vmpackc.low %vm1427_vm2, %vm1812_vm13 }
 0x262   :  { %1573 = vmatprep.subr.bf16.mxu1 %v1690_v0  ;;  %1595 = vmatprep.subr.mxu0 %v1808_v2 }
 0x263   :  { %1596 = vmatpush3.msk.msra.mxu0 %vm1904_vm5, %v1809_v12  ;;  %vm2237_vm5 = vnez %v2229_v13 }
 0x264   :  { %1597 = vmatprep.subr.mxu0 %v1808_v2 }
 0x265   :  { %1574 = vmatpush3.bf16.msra.mxu1 %v1690_v0  ;;  %1598 = vmatpush3.msk.msra.mxu0 %vm1914_vm6, %v1809_v12  ;;  %vm2238_vm6 = vnez %v2231_v14 }
 0x266   :  { %1575 = vmatprep.subr.bf16.mxu1 %v1691_v10  ;;  %1599 = vmatprep.subr.mxu0 %v1808_v2 }
 0x267   :  { %1600 = vmatpush3.msk.msra.mxu0 %vm1924_vm7, %v1809_v12  ;;  %vm2239_vm7 = vnez %v2233_v15 }
 0x268   :  { %1601 = vmatprep.subr.mxu0 %v1808_v2 }
 0x269   :  { %1576 = vmatpush3.bf16.msra.mxu1 %v1691_v10  ;;  %1602 = vmatpush3.msk.msra.mxu0 %vm1934_vm8, %v1809_v12  ;;  %vm2240_vm8 = vcmask 1040384  }
 0x26a   :  { %1577 = vmatprep.subr.bf16.mxu1 %v1692_v30  ;;  %1603 = vmatprep.subr.mxu0 %v1808_v2 }
 0x26b   :  { %1604 = vmatpush3.msk.msra.mxu0 %vm1944_vm9, %v1809_v12 }
 0x26c   :  { %1605 = vmatprep.subr.mxu0 %v1808_v2 }
 0x26d   :  { %1578 = vmatpush3.bf16.msra.mxu1 %v1692_v30  ;;  %1606 = vmatpush3.msk.msra.mxu0 %vm1954_vm10, %v1809_v12  ;;  %v1417_v30 = vld [vmem:[%s2192_s3] ss:$0 sm:$0xff]  ;;  %s1813_s3 = smov [#allocation9]  }
 0x26e   :  { %1579 = vmatprep.subr.bf16.mxu1 %v1693_v33  ;;  %1607 = vmatprep.subr.mxu0 %v1808_v2 }
 0x26f   :  { %1608 = vmatpush3.msk.msra.mxu0 %vm1964_vm11, %v1809_v12 }
 0x270   :  { %1609 = vmatprep.subr.mxu0 %v1808_v2 }
 0x271   :  { %1580 = vmatpush3.bf16.msra.mxu1 %v1693_v33  ;;  %1610 = vmatpush3.msk.msra.mxu0 %vm2235_vm0, %v1809_v12 }
 0x272   :  { %1581 = vmatprep.subr.bf16.mxu1 %v1694_v36  ;;  %1611 = vmatprep.subr.mxu0 %v1808_v2 }
 0x273   :  { %1612 = vmatpush3.msk.msra.mxu0 %vm2236_vm3, %v1809_v12 }
 0x274   :  { %1613 = vmatprep.subr.mxu0 %v1808_v2 }
 0x275   :  { %1582 = vmatpush3.bf16.msra.mxu1 %v1694_v36  ;;  %1614 = vmatpush3.msk.msra.mxu0 %vm2237_vm5, %v1809_v12 }
 0x276   :  { %1615 = vmatprep.subr.mxu0 %v1808_v2 }
 0x277   :  { %1616 = vmatpush3.msk.msra.mxu0 %vm2238_vm6, %v1809_v12 }
 0x278   :  { %1584 = vmatmul.mubr.msk.bf16.vlgmr.msra.gmra.mxu1 %vm1398_vm4, %v1399_v39  ;;  %1617 = vmatprep.subr.mxu0 %v1808_v2 }
 0x279   :  { %1618 = vmatpush3.msk.msra.mxu0 %vm2239_vm7, %v1809_v12 }
 0x318   :  { %v1545_v42 = vpop.f32.mrf.mxu1 }
 0x319   :  { %v1565_v45 = vpop.f32.mrf.mxu0 }
 0x31a   :  { %v878_v48 = vpop.f32.mrf.mxu1  ;;  %v984_v13 = vadd.f32 %v1565_v45, %v1545_v42 }
 0x31b   :  { %v975_v51 = vpop.f32.mrf.mxu0 }
 0x31c   :  { %v1546_v54 = vpop.f32.mrf.mxu1  ;;  %v976_v5 = vadd.f32 %v975_v51, %v878_v48 }
 0x31d   :  { %v1566_v57 = vpop.f32.mrf.mxu0 }
 0x31e   :  { %v881_v59 = vpop.f32.mrf.mxu1  ;;  %v987_v26 = vadd.f32 %v1566_v57, %v1546_v54 }
 0x31f   :  { %v978_v63 = vpop.f32.mrf.mxu0 }
 0x320   :  { %v979_v14 = vadd.f32 %v978_v63, %v881_v59 }
 0x338   :  { %v1585_v60 = vpop.f32.mrf.mxu1 }
 0x339   :  { %v1108_v31 = vadd.f32 %v1585_v60, %v984_v13 }
 0x33a   :  { %v1091_v1 = vpop.f32.mrf.mxu1 }
 0x33b   :  { %v1106_v23 = vadd.f32 %v1091_v1, %v976_v5  ;;  %v1121_v37 = vmul.f32 %v1108_v31, %v1108_v31 }
 0x33c   :  { %v1586_v11 = vpop.f32.mrf.mxu1 }
 0x33d   :  { %v1119_v12 = vmul.f32 %v1106_v23, %v1106_v23  ;;  %v1109_v32 = vadd.f32 %v1586_v11, %v987_v26 }
 0x33e   :  { %v1094_v2 = vpop.f32.mrf.mxu1 }
 0x33f   :  { %v1107_v15 = vadd.f32 %v1094_v2, %v979_v14  ;;  %v1122_v6 = vmul.f32 %v1109_v32, %v1109_v32 }
 0x341   :  { %v1110_v34 = vadd.f32 %v1107_v15, %v1106_v23  ;;  %v1120_v35 = vmul.f32 %v1107_v15, %v1107_v15 }
 0x343   :  { %v1111_v16 = vadd.f32 %v1110_v34, %v1108_v31  ;;  %v1123_v18 = vadd.f32 %v1120_v35, %v1119_v12 }
 0x345   :  { %v1112_v27 = vadd.f32 %v1111_v16, %v1109_v32  ;;  %v1124_v38 = vadd.f32 %v1123_v18, %v1121_v37 }
 0x347   :  { %v1113_v40 = vrot.slane %v1112_v27, 4  ;;  %v1125_v41 = vadd.f32 %v1124_v38, %v1122_v6 }
 0x349   :  { %v1114_v43 = vadd.f32 %v1113_v40, %v1112_v27  ;;  %v1126_v44 = vrot.slane %v1125_v41, 4 }
 0x34b   :  { %v1115_v46 = vrot.slane %v1114_v43, 2  ;;  %v1127_v47 = vadd.f32 %v1126_v44, %v1125_v41 }
 0x34d   :  { %v1116_v49 = vadd.f32 %v1115_v46, %v1114_v43  ;;  %v1128_v50 = vrot.slane %v1127_v47, 2 }
 0x34f   :  { %v1117_v52 = vrot.slane %v1116_v49, 1  ;;  %v1129_v53 = vadd.f32 %v1128_v50, %v1127_v47 }
 0x351   :  { %v1130_v7 = vrot.slane %v1129_v53, 1  ;;  %v1118_v55 = vadd.f32 %v1117_v52, %v1116_v49 }
 0x353   :  { %v1131_v56 = vadd.f32 %v1130_v7, %v1129_v53 }
 0x355   :  { %v1132_v58 = vsel %vm2240_vm8, %v1118_v55, %v1131_v56 }
 0x356   :  { %1620 = vmatmul.mubr.f32.vlgmr.msra.gmra.mxu0 %v1132_v58 }
 0x416   :  { %v1199_v61 = vpop.f32.mrf.mxu0 }
 0x417   :  { %v1203_v4 = vmul.f32 0.001953125, %v1199_v61 }
 0x418   :  { %v1621_v8 = vpop.f32.mrf.mxu0 }
 0x419   :  { %v1204_v9 = vmul.f32 %v1203_v4, %v1203_v4  ;;  %v1212_v24 = vrot.slane %v1203_v4, %v606_v17  ;;  %v1418_v17 = vld [vmem:[%s2193_s4] ss:$0 sm:$0xff]  ;;  %s1286_s4 = sshll.u32 %s1813_s3, 4  ;;  %s1287_s4 = int_to_ptr.vmem [resolvable:$true] %s1286_s4 }
 0x41a   :  { %s1773_s17 = scalar_lea.vmem %s1287_s4, 512  ;;  %p1778_p2 = scmp.lt.s32.totalorder %s1287_s4, %s1287_s4 }
 0x41b   :  { %v1206_v19 = vrot.slane %v1204_v9, 7  ;;  %v1213_v28 = vsub.f32 %v1106_v23, %v1212_v24  ;;  %v1214_v29 = vsub.f32 %v1107_v15, %v1212_v24  ;;  %v1215_v62 = vsub.f32 %v1108_v31, %v1212_v24  ;;  %p1774_p1 = scmp.ne.s32.totalorder %s1287_s4, %s1773_s17  ;;  %p1779_p3 = scmp.lt.s32.totalorder %s1773_s17, %s1773_s17 }
 0x41c   :  { %v1216_v0 = vsub.f32 %v1109_v32, %v1212_v24 }
 0x41d   :  { %v1208_v21 = vsub.f32 %v1203_v4, %v1206_v19  ;;  %p1780_p4 = por %p1779_p3, %p1778_p2 }
 0x41f   :  { %v1217_v22 = vadd.f32 1e-05, %v1208_v21  ;;  %p1781_p5 = pnand %p1780_p4, %p1774_p1 }
 0x421   :  { %1695 = vrsqrt.f32 %v1217_v22 }
 0x42e   :  { %v1696_v25 = vpop.eup %1695 }
 0x42f   :  { %v1222_v10 = vrot.slane %v1696_v25, %v616_v20 }
 0x431   :  { %v1223_v33 = vmul.f32 %v1222_v10, %v1213_v28  ;;  %v1224_v36 = vmul.f32 %v1222_v10, %v1214_v29  ;;  %v1225_v39 = vmul.f32 %v1222_v10, %v1215_v62  ;;  %v1226_v42 = vmul.f32 %v1222_v10, %v1216_v0 }
 0x433   :  { %v1234_v45 = vmul.f32 %v1417_v30, %v1223_v33  ;;  %v1235_v48 = vmul.f32 %v1417_v30, %v1224_v36  ;;  %v1236_v51 = vmul.f32 %v1417_v30, %v1225_v39  ;;  %v1237_v54 = vmul.f32 %v1417_v30, %v1226_v42 }
 0x435   :  { %v1245_v57 = vadd.f32 %v1418_v17, %v1234_v45  ;;  %v1246_v59 = vadd.f32 %v1418_v17, %v1235_v48  ;;  %v1247_v3 = vadd.f32 %v1418_v17, %v1236_v51  ;;  %v1248_v20 = vadd.f32 %v1418_v17, %v1237_v54 }
 0x437   :  { %v1419_v60 = vmul.f32 -1.442695, %v1245_v57  ;;  %v1420_v63 = vmul.f32 -1.442695, %v1246_v59  ;;  %v1421_v1 = vmul.f32 -1.442695, %v1247_v3 }
 0x438   :  { %v1422_v5 = vmul.f32 -1.442695, %v1248_v20 }
 0x439   :  { %1697 = vpow2.f32 %v1419_v60 }
 0x43a   :  { %1699 = vpow2.f32 %v1420_v63 }
 0x43b   :  { %1701 = vpow2.f32 %v1421_v1 }
 0x43c   :  { %1703 = vpow2.f32 %v1422_v5 }
 0x446   :  { %v1698_v11 = vpop.eup %1697 }
 0x447   :  { %v1700_v13 = vpop.eup %1699  ;;  %v1261_v14 = vadd.f32 1.0, %v1698_v11 }
 0x448   :  { %v1702_v23 = vpop.eup %1701  ;;  %v1262_v2 = vadd.f32 1.0, %v1700_v13 }
 0x449   :  { %v1704_v26 = vpop.eup %1703  ;;  %v1263_v31 = vadd.f32 1.0, %v1702_v23  ;;  %1705 = vrcp.f32 %v1261_v14 }
 0x44a   :  { %v1264_v15 = vadd.f32 1.0, %v1704_v26  ;;  %1707 = vrcp.f32 %v1262_v2 }
 0x44b   :  { %1709 = vrcp.f32 %v1263_v31 }
 0x44c   :  { %1711 = vrcp.f32 %v1264_v15 }
 0x456   :  { %v1706_v12 = vpop.eup %1705 }
 0x457   :  { %v1708_v32 = vpop.eup %1707  ;;  %v1273_v34 = vmul.f32 %v1706_v12, %v1245_v57 }
 0x458   :  { %v1710_v35 = vpop.eup %1709  ;;  %v1274_v37 = vmul.f32 %v1708_v32, %v1246_v59 }
 0x459   :  { %v1712_v16 = vpop.eup %1711  ;;  %v1275_v18 = vmul.f32 %v1710_v35, %v1247_v3  ;;  %1277 = vst [vmem:[#allocation9] sm:$0xff] %v1273_v34 }
 0x45a   :  { %v1276_v6 = vmul.f32 %v1712_v16, %v1248_v20  ;;  %1278 = vst [vmem:[#allocation9 + $0x8] sm:$0xff] %v1274_v37 }
 0x45b   :  { %1279 = vst [vmem:[#allocation9 + $0x10] sm:$0xff] %v1275_v18 }
 0x45c   :  { %1280 = vst [vmem:[#allocation9 + $0x18] sm:$0xff] %v1276_v6 }
 0x45d   :  { %1784 = shalt.err (!%p1781_p5)
}
 0x45e   :  { %1292 = dma.vmem_to_hbm [thread:$0]  %s1287_s4, 512, %s2194_s5, [#allocation6], %s1802_s21, %s1802_s21, %s1803_s22  }
 0x45f   :  { %1799 = dma.done.wait [#allocation6], 512  }
 0x460   :  { %1800 = vsyncadd [#allocation6], 4294966784 }
 0x461   :  { %1296 = vsyncpa [#allocation5], 1 }
 0x462   :  { %1297 = vsyncpa [#allocation8], 1 }
 0x463   :  { %1298 = vsyncpa [#allocation6], 1 }
 0x464   :  { %1299 = vsyncmov [#allocation3] }
 0x467   :  { %s1300_s20 = vpop.sfrf %1299 }
 0x468   :  { %p1423_p6 = scmp.ne.s32.totalorder %s1300_s20, 0 }
 0x46a   :  { %1304 = shalt.err (%p1423_p6)  }

</bundles_post_ra>
